<compile_context>
chip_gen: v6e
topology: v6e:2x2x1
jax: 0.10.0
libtpu: 0.0.40
codegen_flags: <defaults>
</compile_context>

<pallas_src>
import jax
import jax.numpy as jnp
from jax.experimental import pallas as pl
from jax.experimental.pallas import tpu as pltpu

BN_EPS = 1e-5   # PyTorch BatchNorm1d default eps
H1 = 512        # block1 hidden width (fixed by the module)
H2 = 256        # block2 / residual width (fixed by the module)


def _improved_classifier_kernel(
    x_ref,                 # (tb, in)            input dtype
    w1_ref, b1_ref,        # (in, 512) bf16, (1, 512) f32   [BN1 folded]
    w2_ref, b2_ref,        # (512, 256) bf16, (1, 256) f32  [BN2 folded]
    wout_ref,              # (256, out_pad) bf16
    wskip_ref,             # (in, out_pad) bf16             [wres @ wout folded]
    bout_ref,              # (1, out_pad) f32               [bout + bres @ wout]
    out_ref,               # (tb, out_pad) f32
):
    xb = x_ref[...].astype(jnp.bfloat16)

    # block1: Linear+BN folded -> ReLU (Dropout = identity in eval)
    h1 = jnp.maximum(
        jnp.dot(xb, w1_ref[...], preferred_element_type=jnp.float32) + b1_ref[...],
        0.0)

    # block2: Linear+BN folded -> ReLU
    h2 = jnp.maximum(
        jnp.dot(h1.astype(jnp.bfloat16), w2_ref[...],
                preferred_element_type=jnp.float32) + b2_ref[...],
        0.0)

    # output head with folded residual:  (h2 + x@wres + bres) @ wout + bout
    #   == h2 @ wout + x @ (wres@wout) + (bout + bres@wout)
    logits = (
        jnp.dot(h2.astype(jnp.bfloat16), wout_ref[...],
                preferred_element_type=jnp.float32)
        + jnp.dot(xb, wskip_ref[...], preferred_element_type=jnp.float32)
        + bout_ref[...]
    )

    # sigmoid: EUP exp + approx reciprocal (keeps the VALU free)
    out_ref[...] = pl.reciprocal(1.0 + jnp.exp(-logits), approx=True).astype(
        out_ref.dtype)


def _round_up(x, m):
    return ((x + m - 1) // m) * m


def improved_classifier_forward(x, params, *, batch_tile=512):
    """Eval-mode forward pass.  x: (batch, input_size) array."""
    batch, in_features = x.shape
    out_features = params["wout"].shape[1]
    out_pad = _round_up(out_features, 128)   # lane-dense output stores

    f32 = jnp.float32

    # ---- host-side folding (all in f32, then cast weights to bf16) ----------
    # BatchNorm1d folded into the preceding Linear (column scale + shifted bias)
    scale1 = params["bn1_gamma"].astype(f32) * jax.lax.rsqrt(
        params["bn1_var"].astype(f32) + BN_EPS)
    w1 = params["w1"].astype(f32) * scale1[None, :]
    b1 = (params["b1"].astype(f32) - params["bn1_mean"].astype(f32)) * scale1 \
        + params["bn1_beta"].astype(f32)

    scale2 = params["bn2_gamma"].astype(f32) * jax.lax.rsqrt(
        params["bn2_var"].astype(f32) + BN_EPS)
    w2 = params["w2"].astype(f32) * scale2[None, :]
    b2 = (params["b2"].astype(f32) - params["bn2_mean"].astype(f32)) * scale2 \
        + params["bn2_beta"].astype(f32)

    # Residual branch folded through the output head.
    wout = params["wout"].astype(f32)                       # (256, out)
    wskip = params["wres"].astype(f32) @ wout               # (in, out)
    bout = params["bout"].astype(f32) + params["bres"].astype(f32) @ wout

    # Zero-pad the output feature axis to a multiple of 128.
    if out_pad != out_features:
        pad = ((0, 0), (0, out_pad - out_features))
        wout = jnp.pad(wout, pad)
        wskip = jnp.pad(wskip, pad)
        bout = jnp.pad(bout, (0, out_pad - out_features))

    operands = (
        x,                                          # kernel casts per tile
        w1.astype(jnp.bfloat16), b1.reshape(1, H1),
        w2.astype(jnp.bfloat16), b2.reshape(1, H2),
        wout.astype(jnp.bfloat16),
        wskip.astype(jnp.bfloat16),
        bout.reshape(1, out_pad),
    )

    # ---- grid / tiling -------------------------------------------------------
    # Full-array batch block when batch is small (always a legal block shape);
    # otherwise 512-row tiles (multiple of 8 sublanes), ragged last tile handled
    # by Pallas partial blocks (rows independent, no cross-row reduction).
    tb = batch_tile if batch >= batch_tile else batch
    grid = (pl.cdiv(batch, tb),)

    # VMEM budget from actual footprint (double-buffered weights/tiles + temps),
    # with 2x headroom, clamped so it is safe on v7x's 64 MiB per-TC VMEM.
    weight_bytes = 2 * (
        2 * (in_features * H1 + H1 * H2 + H2 * out_pad + in_features * out_pad)
        + 4 * (H1 + H2 + out_pad))
    act_bytes = 2 * tb * (in_features + out_pad) * 4
    tmp_bytes = tb * (2 * H1 + 2 * H2 + 2 * out_pad) * 4
    vmem_limit = int(min(max(2 * (weight_bytes + act_bytes + tmp_bytes),
                             16 * 1024 * 1024),
                         48 * 1024 * 1024))

    row_block = lambda i: (i, 0)   # batch-tiled operands
    resident = lambda i: (0, 0)    # weights / biases: constant -> stay in VMEM

    in_specs = [
        pl.BlockSpec((tb, in_features), row_block),
        pl.BlockSpec((in_features, H1), resident), pl.BlockSpec((1, H1), resident),
        pl.BlockSpec((H1, H2), resident), pl.BlockSpec((1, H2), resident),
        pl.BlockSpec((H2, out_pad), resident),
        pl.BlockSpec((in_features, out_pad), resident),
        pl.BlockSpec((1, out_pad), resident),
    ]

    out = pl.pallas_call(
        _improved_classifier_kernel,
        out_shape=jax.ShapeDtypeStruct((batch, out_pad), jnp.float32),
        grid=grid,
        in_specs=in_specs,
        out_specs=pl.BlockSpec((tb, out_pad), row_block),
        compiler_params=pltpu.CompilerParams(
            dimension_semantics=("parallel",),
            vmem_limit_bytes=vmem_limit,
        ),
    )(*operands)
    return out[:, :out_features]


def _forward_ref(x, params):
    """Pure-JAX f32 reference matching PyTorch eval-mode semantics."""
    x = x.astype(jnp.float32)
    y1 = x @ params["w1"] + params["b1"]
    y1 = (y1 - params["bn1_mean"]) / jnp.sqrt(params["bn1_var"] + BN_EPS)
    y1 = y1 * params["bn1_gamma"] + params["bn1_beta"]
    h1 = jnp.maximum(y1, 0.0)
    y2 = h1 @ params["w2"] + params["b2"]
    y2 = (y2 - params["bn2_mean"]) / jnp.sqrt(params["bn2_var"] + BN_EPS)
    y2 = y2 * params["bn2_gamma"] + params["bn2_beta"]
    h2 = jnp.maximum(y2, 0.0)
    res = (x @ params["wres"] + params["bres"])[:, :H2]
    logits = (h2 + res) @ params["wout"] + params["bout"]
    return jax.nn.sigmoid(logits)


if __name__ == "__main__":
    key = jax.random.PRNGKey(0)
    ks = jax.random.split(key, 16)

    batch, input_size, output_size = 8, 32, 16

    params = {
        "w1": jax.random.normal(ks[0], (input_size, H1), jnp.float32) * 0.08,
        "b1": jax.random.normal(ks[1], (H1,), jnp.float32) * 0.02,
        "bn1_gamma": 1.0 + 0.1 * jax.random.normal(ks[2], (H1,), jnp.float32),
        "bn1_beta": 0.05 * jax.random.normal(ks[3], (H1,), jnp.float32),
        "bn1_mean": 0.05 * jax.random.normal(ks[4], (H1,), jnp.float32),
        "bn1_var": 0.9 + 0.2 * jax.random.uniform(ks[5], (H1,), jnp.float32),
        "w2": jax.random.normal(ks[6], (H1, H2), jnp.float32) * 0.04,
        "b2": jax.random.normal(ks[7], (H2,), jnp.float32) * 0.02,
        "bn2_gamma": 1.0 + 0.1 * jax.random.normal(ks[8], (H2,), jnp.float32),
        "bn2_beta": 0.05 * jax.random.normal(ks[9], (H2,), jnp.float32),
        "bn2_mean": 0.05 * jax.random.normal(ks[10], (H2,), jnp.float32),
        "bn2_var": 0.9 + 0.2 * jax.random.uniform(ks[11], (H2,), jnp.float32),
        "wres": jax.random.normal(ks[12], (input_size, H2), jnp.float32) * 0.08,
        "bres": jax.random.normal(ks[13], (H2,), jnp.float32) * 0.02,
        "wout": jax.random.normal(ks[14], (H2, output_size), jnp.float32) * 0.06,
        "bout": jnp.zeros((output_size,), jnp.float32),
    }
    x = jax.random.normal(ks[15], (batch, input_size), jnp.float32)

    y = improved_classifier_forward(x, params)
    jax.block_until_ready(y)

    y_ref = _forward_ref(x, params)
    assert y.shape == (batch, output_size)
    # bf16 MXU inputs + host-side BN/residual folding + approx reciprocal change
    # rounding order; accumulation is still f32, so a modest tolerance suffices.
    assert jnp.allclose(y, y_ref, rtol=2e-2, atol=2e-2), float(
        jnp.max(jnp.abs(y - y_ref)))

    print("KERNEL_OK")
</pallas_src>

<mosaic_0001>
module attributes {stable_mosaic.version = 11 : i64} {
  func.func @_improved_classifier_kernel(%arg0: i32, %arg1: memref<8x32xf32, #tpu.memory_space<vmem>>, %arg2: memref<32x512xbf16, #tpu.memory_space<vmem>>, %arg3: memref<1x512xf32, #tpu.memory_space<vmem>>, %arg4: memref<512x256xbf16, #tpu.memory_space<vmem>>, %arg5: memref<1x256xf32, #tpu.memory_space<vmem>>, %arg6: memref<256x128xbf16, #tpu.memory_space<vmem>>, %arg7: memref<32x128xbf16, #tpu.memory_space<vmem>>, %arg8: memref<1x128xf32, #tpu.memory_space<vmem>>, %arg9: memref<8x128xf32, #tpu.memory_space<vmem>>) attributes {dimension_semantics = [#tpu.dimension_semantics<parallel>], iteration_bounds = array<i64: 1>, scalar_prefetch = 0 : i64, scratch_operands = 0 : i64, tpu.core_type = #tpu.core_type<tc>, window_params = [{transform_indices = @transform_0, window_bounds = array<i64: 8, 32>}, {pipeline_mode = #tpu.pipeline_mode<synchronous>, transform_indices = @transform_1, window_bounds = array<i64: 32, 512>}, {pipeline_mode = #tpu.pipeline_mode<synchronous>, transform_indices = @transform_2, window_bounds = array<i64: 1, 512>}, {pipeline_mode = #tpu.pipeline_mode<synchronous>, transform_indices = @transform_3, window_bounds = array<i64: 512, 256>}, {pipeline_mode = #tpu.pipeline_mode<synchronous>, transform_indices = @transform_4, window_bounds = array<i64: 1, 256>}, {pipeline_mode = #tpu.pipeline_mode<synchronous>, transform_indices = @transform_5, window_bounds = array<i64: 256, 128>}, {pipeline_mode = #tpu.pipeline_mode<synchronous>, transform_indices = @transform_6, window_bounds = array<i64: 32, 128>}, {pipeline_mode = #tpu.pipeline_mode<synchronous>, transform_indices = @transform_7, window_bounds = array<i64: 1, 128>}, {transform_indices = @transform_8, window_bounds = array<i64: 8, 128>}]} {
    %c0 = arith.constant 0 : index
    %c0_0 = arith.constant 0 : index
    %0 = vector.load %arg1[%c0, %c0_0] : memref<8x32xf32, #tpu.memory_space<vmem>>, vector<8x32xf32>
    %1 = arith.truncf %0 : vector<8x32xf32> to vector<8x32xbf16>
    %c0_1 = arith.constant 0 : index
    %c0_2 = arith.constant 0 : index
    %2 = vector.load %arg2[%c0_1, %c0_2] : memref<32x512xbf16, #tpu.memory_space<vmem>>, vector<32x512xbf16>
    %cst = arith.constant dense<0.000000e+00> : vector<8x512xf32>
    %3 = tpu.matmul %1, %2, %cst {dimension_numbers = #tpu.dot_dimension_numbers<[1], [0], [0], [1], [0, 0, 1, 1], [], []>} : vector<8x32xbf16>, vector<32x512xbf16>, vector<8x512xf32> -> vector<8x512xf32>
    %c0_3 = arith.constant 0 : index
    %c0_4 = arith.constant 0 : index
    %4 = vector.load %arg3[%c0_3, %c0_4] : memref<1x512xf32, #tpu.memory_space<vmem>>, vector<1x512xf32>
    %5 = vector.broadcast %4 : vector<1x512xf32> to vector<8x512xf32>
    %6 = arith.addf %3, %5 : vector<8x512xf32>
    %cst_5 = arith.constant 0.000000e+00 : f32
    %7 = vector.broadcast %cst_5 : f32 to vector<8x512xf32>
    %8 = arith.maximumf %6, %7 : vector<8x512xf32>
    %9 = arith.truncf %8 : vector<8x512xf32> to vector<8x512xbf16>
    %c0_6 = arith.constant 0 : index
    %c0_7 = arith.constant 0 : index
    %10 = vector.load %arg4[%c0_6, %c0_7] : memref<512x256xbf16, #tpu.memory_space<vmem>>, vector<512x256xbf16>
    %cst_8 = arith.constant dense<0.000000e+00> : vector<8x256xf32>
    %11 = tpu.matmul %9, %10, %cst_8 {dimension_numbers = #tpu.dot_dimension_numbers<[1], [0], [0], [1], [0, 0, 1, 1], [], []>} : vector<8x512xbf16>, vector<512x256xbf16>, vector<8x256xf32> -> vector<8x256xf32>
    %c0_9 = arith.constant 0 : index
    %c0_10 = arith.constant 0 : index
    %12 = vector.load %arg5[%c0_9, %c0_10] : memref<1x256xf32, #tpu.memory_space<vmem>>, vector<1x256xf32>
    %13 = vector.broadcast %12 : vector<1x256xf32> to vector<8x256xf32>
    %14 = arith.addf %11, %13 : vector<8x256xf32>
    %cst_11 = arith.constant 0.000000e+00 : f32
    %15 = vector.broadcast %cst_11 : f32 to vector<8x256xf32>
    %16 = arith.maximumf %14, %15 : vector<8x256xf32>
    %17 = arith.truncf %16 : vector<8x256xf32> to vector<8x256xbf16>
    %c0_12 = arith.constant 0 : index
    %c0_13 = arith.constant 0 : index
    %18 = vector.load %arg6[%c0_12, %c0_13] : memref<256x128xbf16, #tpu.memory_space<vmem>>, vector<256x128xbf16>
    %cst_14 = arith.constant dense<0.000000e+00> : vector<8x128xf32>
    %19 = tpu.matmul %17, %18, %cst_14 {dimension_numbers = #tpu.dot_dimension_numbers<[1], [0], [0], [1], [0, 0, 1, 1], [], []>} : vector<8x256xbf16>, vector<256x128xbf16>, vector<8x128xf32> -> vector<8x128xf32>
    %c0_15 = arith.constant 0 : index
    %c0_16 = arith.constant 0 : index
    %20 = vector.load %arg7[%c0_15, %c0_16] : memref<32x128xbf16, #tpu.memory_space<vmem>>, vector<32x128xbf16>
    %cst_17 = arith.constant dense<0.000000e+00> : vector<8x128xf32>
    %21 = tpu.matmul %1, %20, %cst_17 {dimension_numbers = #tpu.dot_dimension_numbers<[1], [0], [0], [1], [0, 0, 1, 1], [], []>} : vector<8x32xbf16>, vector<32x128xbf16>, vector<8x128xf32> -> vector<8x128xf32>
    %22 = arith.addf %19, %21 : vector<8x128xf32>
    %c0_18 = arith.constant 0 : index
    %c0_19 = arith.constant 0 : index
    %23 = vector.load %arg8[%c0_18, %c0_19] : memref<1x128xf32, #tpu.memory_space<vmem>>, vector<1x128xf32>
    %24 = vector.broadcast %23 : vector<1x128xf32> to vector<8x128xf32>
    %25 = arith.addf %22, %24 : vector<8x128xf32>
    %cst_20 = arith.constant 0.000000e+00 : f32
    %26 = vector.broadcast %cst_20 : f32 to vector<8x128xf32>
    %27 = arith.subf %26, %25 : vector<8x128xf32>
    %28 = math.exp %27 : vector<8x128xf32>
    %cst_21 = arith.constant 1.000000e+00 : f32
    %29 = vector.broadcast %cst_21 : f32 to vector<8x128xf32>
    %30 = arith.addf %29, %28 : vector<8x128xf32>
    %31 = tpu.reciprocal %30 {approx = true} : vector<8x128xf32> -> vector<8x128xf32>
    %c0_22 = arith.constant 0 : index
    %c0_23 = arith.constant 0 : index
    %32 = vector.load %arg9[%c0_22, %c0_23] : memref<8x128xf32, #tpu.memory_space<vmem>>, vector<8x128xf32>
    tpu.vector_store %arg9[%c0_22, %c0_23], %31 {strides = array<i32>} : memref<8x128xf32, #tpu.memory_space<vmem>>, vector<8x128xf32>,
    return
  }
  func.func @transform_0(%arg0: i32) -> (i32, i32) {
    %c0_i32 = arith.constant 0 : i32
    %c0_i32_0 = arith.constant 0 : i32
    return %arg0, %c0_i32 : i32, i32
  }
  func.func @transform_1(%arg0: i32) -> (i32, i32) {
    %c0_i32 = arith.constant 0 : i32
    %c0_i32_0 = arith.constant 0 : i32
    %c0_i32_1 = arith.constant 0 : i32
    return %c0_i32, %c0_i32_0 : i32, i32
  }
  func.func @transform_2(%arg0: i32) -> (i32, i32) {
    %c0_i32 = arith.constant 0 : i32
    %c0_i32_0 = arith.constant 0 : i32
    %c0_i32_1 = arith.constant 0 : i32
    return %c0_i32, %c0_i32_0 : i32, i32
  }
  func.func @transform_3(%arg0: i32) -> (i32, i32) {
    %c0_i32 = arith.constant 0 : i32
    %c0_i32_0 = arith.constant 0 : i32
    %c0_i32_1 = arith.constant 0 : i32
    return %c0_i32, %c0_i32_0 : i32, i32
  }
  func.func @transform_4(%arg0: i32) -> (i32, i32) {
    %c0_i32 = arith.constant 0 : i32
    %c0_i32_0 = arith.constant 0 : i32
    %c0_i32_1 = arith.constant 0 : i32
    return %c0_i32, %c0_i32_0 : i32, i32
  }
  func.func @transform_5(%arg0: i32) -> (i32, i32) {
    %c0_i32 = arith.constant 0 : i32
    %c0_i32_0 = arith.constant 0 : i32
    %c0_i32_1 = arith.constant 0 : i32
    return %c0_i32, %c0_i32_0 : i32, i32
  }
  func.func @transform_6(%arg0: i32) -> (i32, i32) {
    %c0_i32 = arith.constant 0 : i32
    %c0_i32_0 = arith.constant 0 : i32
    %c0_i32_1 = arith.constant 0 : i32
    return %c0_i32, %c0_i32_0 : i32, i32
  }
  func.func @transform_7(%arg0: i32) -> (i32, i32) {
    %c0_i32 = arith.constant 0 : i32
    %c0_i32_0 = arith.constant 0 : i32
    %c0_i32_1 = arith.constant 0 : i32
    return %c0_i32, %c0_i32_0 : i32, i32
  }
  func.func @transform_8(%arg0: i32) -> (i32, i32) {
    %c0_i32 = arith.constant 0 : i32
    %c0_i32_0 = arith.constant 0 : i32
    return %arg0, %c0_i32 : i32, i32
  }
}

</mosaic_0001>

<bundles_post_ra>
// kernel: tpu_custom_call.1
= control target key start
LH: loop header
LB: loop body
LE: loop exit
PB: predicated region body
PF: predicated region fallthrough
CT: control target
= control target key end

     0   :  { %13 = vsyncpa [#allocation3], 0  ;;  %s1546_s0 = inlined_call_operand.hbm [shape: f32[8,32], index: 0, kind: input, shape index: {}]   ;;  %s1547_s1 = inlined_call_operand.hbm [shape: bf16[32,512], index: 1, kind: input, shape index: {}]   ;;  %s1548_s2 = inlined_call_operand.hbm [shape: f32[1,512], index: 2, kind: input, shape index: {}]   ;;  %s1549_s3 = inlined_call_operand.hbm [shape: bf16[512,256], index: 3, kind: input, shape index: {}]   ;;  %s1550_s4 = inlined_call_operand.vmem [shape: f32[1,256], index: 4, kind: input, shape index: {}]   ;;  %s1551_s5 = inlined_call_operand.hbm [shape: bf16[256,128], index: 5, kind: input, shape index: {}]   ;;  %s1552_s6 = inlined_call_operand.hbm [shape: bf16[32,128], index: 6, kind: input, shape index: {}]   ;;  %s1553_s7 = inlined_call_operand.vmem [shape: f32[1,128], index: 7, kind: input, shape index: {}]   ;;  %s1554_s8 = inlined_call_operand.hbm [shape: f32[8,128], index: 8, kind: output, shape index: {}]  }
   0x1   :  { %14 = vsyncpa [#allocation6], 0 }
   0x2   :  { %15 = vsyncpa [#allocation9], 0 }
   0x3   :  { %16 = vsyncpa [#allocation12], 0 }
   0x4   :  { %17 = vsyncpa [#allocation4], 0  ;;  %s1436_s27 = smov [#allocation5]  }
   0x5   :  { %s33_s28 = sshll.u32 %s1436_s27, 4  ;;  %s34_s28 = int_to_ptr.vmem [resolvable:$true] %s33_s28 }
   0x6   :  { %s1294_s29 = scalar_lea.vmem %s34_s28, 1024  ;;  %p1299_p1 = scmp.lt.s32.totalorder %s34_s28, %s34_s28 }
   0x7   :  { %p1295_p0 = scmp.ne.s32.totalorder %s34_s28, %s1294_s29  ;;  %p1300_p2 = scmp.lt.s32.totalorder %s1294_s29, %s1294_s29 }
   0x9   :  { %p1301_p3 = por %p1300_p2, %p1299_p1 }
   0xb   :  { %p1302_p4 = pnand %p1301_p3, %p1295_p0 }
   0xd   :  { %1305 = shalt.err (!%p1302_p4)
}
   0xe   :  { %s1437_s30 = smov 256   ;;  %s1438_s9 = smov 16  }
   0xf   :  { %39 = dma.hbm_to_vmem [thread:$0]  %s1547_s1, 1024, %s34_s28, [#allocation6], %s1437_s30, %s1437_s30, %s1438_s9  }
  0x10   :  { %s1439_s12 = smov [#allocation8]  }
  0x11   :  { %s55_s13 = sshll.u32 %s1439_s12, 4  ;;  %s56_s13 = int_to_ptr.vmem [resolvable:$true] %s55_s13 }
  0x12   :  { %s1314_s14 = scalar_lea.vmem %s56_s13, 8192  ;;  %p1319_p6 = scmp.lt.s32.totalorder %s56_s13, %s56_s13 }
  0x13   :  { %p1315_p5 = scmp.ne.s32.totalorder %s56_s13, %s1314_s14  ;;  %p1320_p7 = scmp.lt.s32.totalorder %s1314_s14, %s1314_s14 }
  0x15   :  { %p1321_p8 = por %p1320_p7, %p1319_p6 }
  0x17   :  { %p1322_p9 = pnand %p1321_p8, %p1315_p5 }
  0x19   :  { %1325 = shalt.err (!%p1322_p9)
}
  0x1a   :  { %s1440_s15 = smov 128   ;;  %s1441_s16 = smov 8  }
  0x1b   :  { %61 = dma.hbm_to_vmem [thread:$0]  %s1549_s3, 8192, %s56_s13, [#allocation9], %s1440_s15, %s1440_s15, %s1441_s16  }
  0x1c   :  { %s1442_s19 = smov [#allocation2]   ;;  %s1443_s21 = smov [#allocation7]  }
  0x1d   :  { %s24_s20 = sshll.u32 %s1442_s19, 4  ;;  %s46_s1 = sshll.u32 %s1443_s21, 4  ;;  %s25_s20 = int_to_ptr.vmem [resolvable:$true] %s24_s20  ;;  %s47_s1 = int_to_ptr.vmem [resolvable:$true] %s46_s1 }
  0x1e   :  { %s1334_s22 = scalar_lea.vmem %s25_s20, 128  ;;  %p1339_p11 = scmp.lt.s32.totalorder %s25_s20, %s25_s20 }
  0x1f   :  { %p1335_p10 = scmp.ne.s32.totalorder %s25_s20, %s1334_s22  ;;  %p1340_p12 = scmp.lt.s32.totalorder %s1334_s22, %s1334_s22 }
  0x21   :  { %p1341_p13 = por %p1340_p12, %p1339_p11 }
  0x23   :  { %p1342_p0 = pnand %p1341_p13, %p1335_p10 }
  0x25   :  { %1345 = shalt.err (!%p1342_p0)
}
  0x26   :  { %27 = dma.hbm_to_vmem [thread:$0]  %s1546_s0, 128, %s25_s20, [#allocation3]  }
  0x27   :  { %s1354_s25 = scalar_lea.vmem %s47_s1, 64  ;;  %p1359_p2 = scmp.lt.s32.totalorder %s47_s1, %s47_s1 }
  0x28   :  { %p1355_p1 = scmp.ne.s32.totalorder %s47_s1, %s1354_s25  ;;  %p1360_p3 = scmp.lt.s32.totalorder %s1354_s25, %s1354_s25 }
  0x2a   :  { %p1361_p4 = por %p1360_p3, %p1359_p2 }
  0x2c   :  { %p1362_p5 = pnand %p1361_p4, %p1355_p1 }
  0x2e   :  { %1365 = shalt.err (!%p1362_p5)
}
  0x2f   :  { %49 = dma.hbm_to_vmem [thread:$0]  %s1548_s2, 64, %s47_s1, [#allocation6]  }
  0x30   :  { %s1444_s27 = smov [#allocation10]  }
  0x31   :  { %s69_s28 = sshll.u32 %s1444_s27, 4  ;;  %s70_s28 = int_to_ptr.vmem [resolvable:$true] %s69_s28 }
  0x32   :  { %s1374_s29 = scalar_lea.vmem %s70_s28, 2048  ;;  %p1379_p7 = scmp.lt.s32.totalorder %s70_s28, %s70_s28 }
  0x33   :  { %p1375_p6 = scmp.ne.s32.totalorder %s70_s28, %s1374_s29  ;;  %p1380_p8 = scmp.lt.s32.totalorder %s1374_s29, %s1374_s29 }
  0x35   :  { %p1381_p9 = por %p1380_p8, %p1379_p7 }
  0x37   :  { %p1382_p10 = pnand %p1381_p9, %p1375_p6 }
  0x39   :  { %1385 = shalt.err (!%p1382_p10)
}
  0x3a   :  { %s1445_s0 = smov 64   ;;  %s1446_s30 = smov 4  }
  0x3b   :  { %75 = dma.hbm_to_vmem [thread:$0]  %s1551_s5, 2048, %s70_s28, [#allocation9], %s1445_s0, %s1445_s0, %s1446_s30  }
  0x3c   :  { %s1447_s11 = smov [#allocation11]  }
  0x3d   :  { %s81_s12 = sshll.u32 %s1447_s11, 4  ;;  %s82_s12 = int_to_ptr.vmem [resolvable:$true] %s81_s12 }
  0x3e   :  { %s1394_s2 = scalar_lea.vmem %s82_s12, 256  ;;  %p1399_p12 = scmp.lt.s32.totalorder %s82_s12, %s82_s12 }
  0x3f   :  { %p1395_p11 = scmp.ne.s32.totalorder %s82_s12, %s1394_s2  ;;  %p1400_p13 = scmp.lt.s32.totalorder %s1394_s2, %s1394_s2 }
  0x41   :  { %p1401_p0 = por %p1400_p13, %p1399_p12 }
  0x43   :  { %p1402_p1 = pnand %p1401_p0, %p1395_p11 }
  0x45   :  { %1405 = shalt.err (!%p1402_p1)
}
  0x46   :  { %87 = dma.hbm_to_vmem [thread:$0]  %s1552_s6, 256, %s82_s12, [#allocation12], %s1445_s0, %s1445_s0, %s1446_s30  }
  0x47   :  { %1426 = dma.done.wait [#allocation3], 128  }
  0x48   :  { %1427 = vsyncadd [#allocation3], 4294967168 }
  0x49   :  { %1428 = dma.done.wait [#allocation6], 1088  }
  0x4a   :  { %1429 = vsyncadd [#allocation6], 4294966208 }
  0x4b   :  { %1430 = dma.done.wait [#allocation9], 10240  }
  0x4c   :  { %1431 = vsyncadd [#allocation9], 4294957056 }
  0x4d   :  { %1432 = dma.done.wait [#allocation12], 256  }
  0x4e   :  { %1433 = vsyncadd [#allocation12], 4294967040  ;;  %v1448_v0 = vmov 0   ;;  %v1156_v1 = vld [vmem:[#allocation5 + $0x24] ss:$16 sps:$4 sm:$0xff]   ;;  %v109_v5 = vld [vmem:[#allocation2] sm:$0xff] }
  0x4f   :  { %217 = vmatprep.mubr.bf16.mxu0 %v1448_v0  ;;  %v1158_v2 = vld [vmem:[#allocation5 + $0x20] ss:$16 sps:$4 sm:$0xff]   ;;  %197 = vmatprep.subr.bf16.mxu0 %v1156_v1  ;;  %v1159_v3 = vld [vmem:[#allocation5 + $0x4] ss:$16 sps:$4 sm:$0xff]   ;;  %v1164_v6 = vld [vmem:[#allocation5 + $0x2c] ss:$16 sps:$4 sm:$0xff]   ;;  %v1515_v7 = vpack.c.bf16 %v109_v5, %v109_v5 }
  0x50   :  { %v1161_v4 = vld [vmem:[#allocation5] ss:$16 sps:$4 sm:$0xff]   ;;  %198 = vmatpush1.bf16.msra.mxu0 %v1158_v2  ;;  %vm181_vm0 = vcmask 261120   ;;  %v1162_v8 = vld [vmem:[#allocation5 + $0x28] ss:$16 sps:$4 sm:$0xff]   ;;  %vm1450_vm1 = vmmov 0  }
  0x51   :  { %199 = vmatprep.subr.bf16.mxu0 %v1159_v3  ;;  %v1167_v9 = vld [vmem:[#allocation5 + $0xc] ss:$16 sps:$4 sm:$0xff]   ;;  %v1177_v10 = vld [vmem:[#allocation8 + $0x174] ss:$8 sps:$4 sm:$0xff]   ;;  %v1183_v14 = vld [vmem:[#allocation8 + $0x164] ss:$8 sps:$4 sm:$0xff]  }
  0x52   :  { %v1179_v11 = vld [vmem:[#allocation8 + $0x170] ss:$8 sps:$4 sm:$0xff]   ;;  %v1165_v12 = vld [vmem:[#allocation5 + $0x8] ss:$16 sps:$4 sm:$0xff]   ;;  %712 = vmatprep.subr.bf16.mxu1 %v1177_v10  ;;  %v1185_v15 = vld [vmem:[#allocation8 + $0x160] ss:$8 sps:$4 sm:$0xff]  }
  0x53   :  { %v1170_v13 = vld [vmem:[#allocation8 + $0x74] ss:$8 sps:$4 sm:$0xff]   ;;  %713 = vmatpush1.bf16.msra.mxu1 %v1179_v11  ;;  %v1168_v16 = vld [vmem:[#allocation8 + $0x70] ss:$8 sps:$4 sm:$0xff]   ;;  %v1173_v18 = vld [vmem:[#allocation8 + $0x64] ss:$8 sps:$4 sm:$0xff]  }
  0x54   :  { %200 = vmatpush1.bf16.msra.mxu0 %v1161_v4  ;;  %714 = vmatprep.subr.bf16.mxu1 %v1183_v14  ;;  %v1189_v17 = vld [vmem:[#allocation8 + $0x154] ss:$8 sps:$4 sm:$0xff]   ;;  %v1191_v19 = vld [vmem:[#allocation8 + $0x150] ss:$8 sps:$4 sm:$0xff]   ;;  %v1195_v20 = vld [vmem:[#allocation8 + $0x144] ss:$8 sps:$4 sm:$0xff]  }
  0x55   :  { %238 = vmatprep.subr.bf16.mxu0 %v1164_v6  ;;  %v1171_v21 = vld [vmem:[#allocation8 + $0x60] ss:$8 sps:$4 sm:$0xff]   ;;  %v1176_v22 = vld [vmem:[#allocation8 + $0x54] ss:$8 sps:$4 sm:$0xff]   ;;  %v1174_v25 = vld [vmem:[#allocation8 + $0x50] ss:$8 sps:$4 sm:$0xff]  }
  0x56   :  { %v1197_v23 = vld [vmem:[#allocation8 + $0x140] ss:$8 sps:$4 sm:$0xff]   ;;  %v1201_v24 = vld [vmem:[#allocation8 + $0x134] ss:$8 sps:$4 sm:$0xff]   ;;  %v1182_v26 = vld [vmem:[#allocation8 + $0x44] ss:$8 sps:$4 sm:$0xff]  }
  0x57   :  { %1021 = vmatmul.mubr.msk.bf16.vlgmr.msra.gmra.mxu0 %vm181_vm0, %v1515_v7  ;;  %715 = vmatpush1.bf16.msra.mxu1 %v1185_v15  ;;  %v1203_v27 = vld [vmem:[#allocation8 + $0x130] ss:$8 sps:$4 sm:$0xff]   ;;  %v1207_v28 = vld [vmem:[#allocation8 + $0x124] ss:$8 sps:$4 sm:$0xff]   ;;  %v1180_v29 = vld [vmem:[#allocation8 + $0x40] ss:$8 sps:$4 sm:$0xff]  }
  0x58   :  { %239 = vmatpush1.bf16.msra.mxu0 %v1162_v8  ;;  %258 = vmatprep.mubr.bf16.mxu0 %v1448_v0  ;;  %v1188_v30 = vld [vmem:[#allocation8 + $0x34] ss:$8 sps:$4 sm:$0xff]   ;;  %v1209_v31 = vld [vmem:[#allocation8 + $0x120] ss:$8 sps:$4 sm:$0xff]   ;;  %v1186_v33 = vld [vmem:[#allocation8 + $0x30] ss:$8 sps:$4 sm:$0xff]  }
  0x59   :  { %240 = vmatprep.subr.bf16.mxu0 %v1167_v9  ;;  %716 = vmatprep.subr.bf16.mxu1 %v1189_v17  ;;  %v1213_v32 = vld [vmem:[#allocation8 + $0x114] ss:$8 sps:$4 sm:$0xff]   ;;  %v1194_v34 = vld [vmem:[#allocation8 + $0x24] ss:$8 sps:$4 sm:$0xff]   ;;  %v1215_v35 = vld [vmem:[#allocation8 + $0x110] ss:$8 sps:$4 sm:$0xff]  }
  0x5a   :  { %v1219_v36 = vld [vmem:[#allocation8 + $0x104] ss:$8 sps:$4 sm:$0xff]   ;;  %v1192_v37 = vld [vmem:[#allocation8 + $0x20] ss:$8 sps:$4 sm:$0xff]   ;;  %v1200_v38 = vld [vmem:[#allocation8 + $0x14] ss:$8 sps:$4 sm:$0xff]  }
  0x5b   :  { %717 = vmatpush1.bf16.msra.mxu1 %v1191_v19  ;;  %v1221_v39 = vld [vmem:[#allocation8 + $0x100] ss:$8 sps:$4 sm:$0xff]   ;;  %v1198_v40 = vld [vmem:[#allocation8 + $0x10] ss:$8 sps:$4 sm:$0xff]   ;;  %v1225_v41 = vld [vmem:[#allocation8 + $0x1f4] ss:$8 sps:$4 sm:$0xff]  }
  0x5c   :  { %241 = vmatpush1.bf16.msra.mxu0 %v1165_v12  ;;  %718 = vmatprep.subr.bf16.mxu1 %v1195_v20  ;;  %v1206_v42 = vld [vmem:[#allocation8 + $0x4] ss:$8 sps:$4 sm:$0xff]   ;;  %v1227_v43 = vld [vmem:[#allocation8 + $0x1f0] ss:$8 sps:$4 sm:$0xff]   ;;  %v1204_v45 = vld [vmem:[#allocation8] ss:$8 sps:$4 sm:$0xff]  }
  0x5d   :  { %671 = vmatprep.subr.bf16.mxu0 %v1170_v13  ;;  %v1231_v44 = vld [vmem:[#allocation8 + $0x1e4] ss:$8 sps:$4 sm:$0xff]   ;;  %v1212_v46 = vld [vmem:[#allocation8 + $0xf4] ss:$8 sps:$4 sm:$0xff]   ;;  %v1233_v47 = vld [vmem:[#allocation8 + $0x1e0] ss:$8 sps:$4 sm:$0xff]   ;;  %v121_v13 = vlaneseq }
  0x5e   :  { %v1237_v48 = vld [vmem:[#allocation8 + $0x1d4] ss:$8 sps:$4 sm:$0xff]   ;;  %v1210_v49 = vld [vmem:[#allocation8 + $0xf0] ss:$8 sps:$4 sm:$0xff]   ;;  %v1218_v50 = vld [vmem:[#allocation8 + $0xe4] ss:$8 sps:$4 sm:$0xff]  }
  0x5f   :  { %1022 = vmatmul.mubr.msk.bf16.vlgmr.msra.gmra.mxu0 %vm181_vm0, %v1515_v7  ;;  %719 = vmatpush1.bf16.msra.mxu1 %v1197_v23  ;;  %v1239_v51 = vld [vmem:[#allocation8 + $0x1d0] ss:$8 sps:$4 sm:$0xff]   ;;  %v1243_v52 = vld [vmem:[#allocation8 + $0x1c4] ss:$8 sps:$4 sm:$0xff]   ;;  %v1216_v53 = vld [vmem:[#allocation8 + $0xe0] ss:$8 sps:$4 sm:$0xff]  }
  0x60   :  { %672 = vmatpush1.bf16.msra.mxu0 %v1168_v16  ;;  %720 = vmatprep.subr.bf16.mxu1 %v1201_v24  ;;  %v1224_v54 = vld [vmem:[#allocation8 + $0xd4] ss:$8 sps:$4 sm:$0xff]   ;;  %v1245_v55 = vld [vmem:[#allocation8 + $0x1c0] ss:$8 sps:$4 sm:$0xff]   ;;  %v1222_v56 = vld [vmem:[#allocation8 + $0xd0] ss:$8 sps:$4 sm:$0xff]  }
  0x61   :  { %673 = vmatprep.subr.bf16.mxu0 %v1173_v18  ;;  %v1230_v57 = vld [vmem:[#allocation8 + $0xc4] ss:$8 sps:$4 sm:$0xff]   ;;  %v1228_v58 = vld [vmem:[#allocation8 + $0xc0] ss:$8 sps:$4 sm:$0xff]   ;;  %v1236_v59 = vld [vmem:[#allocation8 + $0xb4] ss:$8 sps:$4 sm:$0xff]  }
  0x62   :  { %v1234_v60 = vld [vmem:[#allocation8 + $0xb0] ss:$8 sps:$4 sm:$0xff]   ;;  %v1242_v61 = vld [vmem:[#allocation8 + $0xa4] ss:$8 sps:$4 sm:$0xff]   ;;  %v1240_v62 = vld [vmem:[#allocation8 + $0xa0] ss:$8 sps:$4 sm:$0xff]  }
  0x63   :  { %721 = vmatpush1.bf16.msra.mxu1 %v1203_v27  ;;  %v1248_v63 = vld [vmem:[#allocation8 + $0x94] ss:$8 sps:$4 sm:$0xff]   ;;  %v1246_v1 = vld [vmem:[#allocation8 + $0x90] ss:$8 sps:$4 sm:$0xff]   ;;  %v1254_v3 = vld [vmem:[#allocation8 + $0x84] ss:$8 sps:$4 sm:$0xff]  }
  0x64   :  { %674 = vmatpush1.bf16.msra.mxu0 %v1171_v21  ;;  %722 = vmatprep.subr.bf16.mxu1 %v1207_v28  ;;  %v1249_v0 = vld [vmem:[#allocation8 + $0x1b4] ss:$8 sps:$4 sm:$0xff]   ;;  %v1251_v2 = vld [vmem:[#allocation8 + $0x1b0] ss:$8 sps:$4 sm:$0xff]   ;;  %v1255_v4 = vld [vmem:[#allocation8 + $0x1a4] ss:$8 sps:$4 sm:$0xff]  }
  0x65   :  { %675 = vmatprep.subr.bf16.mxu0 %v1176_v22  ;;  %v1252_v5 = vld [vmem:[#allocation8 + $0x80] ss:$8 sps:$4 sm:$0xff]   ;;  %v1258_v8 = vld [vmem:[#allocation8 + $0x194] ss:$8 sps:$4 sm:$0xff]   ;;  %v1260_v9 = vld [vmem:[#allocation8 + $0x190] ss:$8 sps:$4 sm:$0xff]  }
  0x66   :  { %v1257_v6 = vld [vmem:[#allocation8 + $0x1a0] ss:$8 sps:$4 sm:$0xff]   ;;  %v1261_v10 = vld [vmem:[#allocation8 + $0x184] ss:$8 sps:$4 sm:$0xff]   ;;  %v1264_v12 = vld [vmem:[#allocation10 + $0x78] sm:$0xff]   ;;  %v1521_v14 = vshrl.u32 %v121_v13, 7 }
  0x67   :  { %723 = vmatpush1.bf16.msra.mxu1 %v1209_v31  ;;  %v1263_v11 = vld [vmem:[#allocation8 + $0x180] ss:$8 sps:$4 sm:$0xff]   ;;  %v119_v16 = vld [vmem:[#allocation7] sm:$0xf]  ;;  %s1451_s16 = smov [#allocation13]  }
  0x68   :  { %676 = vmatpush1.bf16.msra.mxu0 %v1174_v25  ;;  %724 = vmatprep.subr.bf16.mxu1 %v1213_v32  ;;  %v123_v15 = vsub.s32 0, %v1521_v14  ;;  %v127_v17 = vsub.s32 1, %v1521_v14  ;;  %v131_v22 = vsub.s32 2, %v1521_v14  ;;  %v135_v25 = vsub.s32 3, %v1521_v14  ;;  %s1001_s17 = sshll.u32 %s1451_s16, 4  ;;  %s1002_s17 = int_to_ptr.vmem [resolvable:$true] %s1001_s17 }
  0x69   :  { %677 = vmatprep.subr.bf16.mxu0 %v1182_v26  ;;  %s1406_s18 = scalar_lea.vmem %s1002_s17, 128  ;;  %p1411_p3 = scmp.lt.s32.totalorder %s1002_s17, %s1002_s17 }
  0x6a   :  { %v124_v18 = vrot.slane %v119_v16, %v123_v15  ;;  %v128_v19 = vrot.slane %v119_v16, %v127_v17  ;;  %v136_v32 = vrot.slane %v119_v16, %v135_v25  ;;  %p1407_p2 = scmp.ne.s32.totalorder %s1002_s17, %s1406_s18  ;;  %p1412_p4 = scmp.lt.s32.totalorder %s1406_s18, %s1406_s18 }
  0x6b   :  { %725 = vmatpush1.bf16.msra.mxu1 %v1215_v35 }
  0x6c   :  { %678 = vmatpush1.bf16.msra.mxu0 %v1180_v29  ;;  %726 = vmatprep.subr.bf16.mxu1 %v1219_v36  ;;  %v132_v29 = vrot.slane %v119_v16, %v131_v22  ;;  %p1413_p5 = por %p1412_p4, %p1411_p3 }
  0x6d   :  { %679 = vmatprep.subr.bf16.mxu0 %v1188_v30 }
  0x6e   :  { %p1414_p6 = pnand %p1413_p5, %p1407_p2 }
  0x6f   :  { %727 = vmatpush1.bf16.msra.mxu1 %v1221_v39 }
  0x70   :  { %680 = vmatpush1.bf16.msra.mxu0 %v1186_v33  ;;  %728 = vmatprep.subr.bf16.mxu1 %v1225_v41 }
  0x71   :  { %681 = vmatprep.subr.bf16.mxu0 %v1194_v34 }
  0x73   :  { %729 = vmatpush2.bf16.msra.mxu1 %v1227_v43  ;;  %v1265_v43 = vld [vmem:[#allocation10 + $0x38] sm:$0xff]  }
  0x74   :  { %682 = vmatpush1.bf16.msra.mxu0 %v1192_v37  ;;  %730 = vmatprep.subr.bf16.mxu1 %v1231_v44 }
  0x75   :  { %683 = vmatprep.subr.bf16.mxu0 %v1200_v38 }
  0x77   :  { %731 = vmatpush2.bf16.msra.mxu1 %v1233_v47  ;;  %v1268_v47 = vld [vmem:[#allocation10 + $0x68] sm:$0xff]  }
  0x78   :  { %684 = vmatpush1.bf16.msra.mxu0 %v1198_v40  ;;  %732 = vmatprep.subr.bf16.mxu1 %v1237_v48  ;;  %v1269_v48 = vld [vmem:[#allocation10 + $0x28] sm:$0xff]  }
  0x79   :  { %685 = vmatprep.subr.bf16.mxu0 %v1206_v42 }
  0x7b   :  { %733 = vmatpush2.bf16.msra.mxu1 %v1239_v51  ;;  %v1272_v51 = vld [vmem:[#allocation10 + $0x58] sm:$0xff]  }
  0x7c   :  { %686 = vmatpush1.bf16.msra.mxu0 %v1204_v45  ;;  %734 = vmatprep.subr.bf16.mxu1 %v1243_v52  ;;  %v1266_v45 = vld [vmem:[#allocation10 + $0x70] sm:$0xff]   ;;  %v1273_v52 = vld [vmem:[#allocation10 + $0x18] sm:$0xff]  }
  0x7d   :  { %687 = vmatprep.subr.bf16.mxu0 %v1212_v46  ;;  %v1267_v46 = vld [vmem:[#allocation10 + $0x30] sm:$0xff]  }
  0x7f   :  { %735 = vmatpush2.bf16.msra.mxu1 %v1245_v55  ;;  %v1276_v55 = vld [vmem:[#allocation11 + $0x8] sm:$0xff]  }
  0x80   :  { %688 = vmatpush2.bf16.msra.mxu0 %v1210_v49  ;;  %736 = vmatprep.subr.bf16.mxu1 %v1249_v0  ;;  %v1270_v49 = vld [vmem:[#allocation10 + $0x60] sm:$0xff]  }
  0x81   :  { %689 = vmatprep.subr.bf16.mxu0 %v1218_v50  ;;  %v1271_v50 = vld [vmem:[#allocation10 + $0x20] sm:$0xff]  }
  0x83   :  { %737 = vmatpush2.bf16.msra.mxu1 %v1251_v2 }
  0x84   :  { %690 = vmatpush2.bf16.msra.mxu0 %v1216_v53  ;;  %738 = vmatprep.subr.bf16.mxu1 %v1255_v4  ;;  %v1274_v53 = vld [vmem:[#allocation10 + $0x50] sm:$0xff]  }
  0x85   :  { %691 = vmatprep.subr.bf16.mxu0 %v1224_v54  ;;  %v1275_v54 = vld [vmem:[#allocation10 + $0x10] sm:$0xff]  }
  0x87   :  { %739 = vmatpush2.bf16.msra.mxu1 %v1257_v6 }
  0x88   :  { %692 = vmatpush2.bf16.msra.mxu0 %v1222_v56  ;;  %740 = vmatprep.subr.bf16.mxu1 %v1258_v8  ;;  %v1449_v56 = vmov 0.0  }
  0x89   :  { %693 = vmatprep.subr.bf16.mxu0 %v1230_v57  ;;  %v1277_v57 = vld [vmem:[#allocation10 + $0x48] sm:$0xff]  }
  0x8b   :  { %741 = vmatpush2.bf16.msra.mxu1 %v1260_v9 }
  0x8c   :  { %694 = vmatpush2.bf16.msra.mxu0 %v1228_v58  ;;  %742 = vmatprep.subr.bf16.mxu1 %v1261_v10  ;;  %v1278_v58 = vld [vmem:[#allocation10 + $0x8] sm:$0xff]  }
  0x8d   :  { %695 = vmatprep.subr.bf16.mxu0 %v1236_v59  ;;  %v1279_v59 = vld [vmem:[#allocation11] sm:$0xff]  }
  0x8f   :  { %743 = vmatpush2.bf16.msra.mxu1 %v1263_v11 }
  0x90   :  { %696 = vmatpush2.bf16.msra.mxu0 %v1234_v60  ;;  %1110 = vmatprep.subr.bf16.mxu1 %v1264_v12  ;;  %v1280_v60 = vld [vmem:[#allocation10 + $0x40] sm:$0xff]  }
  0x91   :  { %697 = vmatprep.subr.bf16.mxu0 %v1242_v61  ;;  %v1281_v61 = vld [vmem:[#allocation10] sm:$0xff]  }
  0x94   :  { %698 = vmatpush2.bf16.msra.mxu0 %v1240_v62  ;;  %v339_v62 = vld [vmem:[%s1550_s4] sm:$0x3] }
  0x95   :  { %699 = vmatprep.subr.bf16.mxu0 %v1248_v63 }
  0x98   :  { %700 = vmatpush2.bf16.msra.mxu0 %v1246_v1  ;;  %v344_v1 = vrot.slane %v339_v62, %v123_v15 }
  0x99   :  { %701 = vmatprep.subr.bf16.mxu0 %v1254_v3  ;;  %v348_v3 = vrot.slane %v339_v62, %v127_v17 }
  0x9c   :  { %702 = vmatpush2.bf16.msra.mxu0 %v1252_v5 }
  0x9d   :  { %1132 = vmatprep.subr.bf16.mxu0 %v1449_v56 }
 0x117   :  { %v219_v20 = vpop.f32.mrf.mxu0 }
 0x118   :  { %v220_v21 = vadd.f32 %v219_v20, %v124_v18 }
 0x119   :  { %v221_v23 = vpop.f32.mrf.mxu0 }
 0x11a   :  { %v222_v24 = vadd.f32 %v221_v23, %v128_v19  ;;  %v267_v26 = vmax.f32 %v220_v21, 0.0 }
 0x11b   :  { %v223_v27 = vpop.f32.mrf.mxu0 }
 0x11c   :  { %v268_v28 = vmax.f32 %v222_v24, 0.0  ;;  %v271_v33 = vpack.c.bf16 %v267_v26, %v267_v26  ;;  %v1106_v24 = vld [vmem:[%s1553_s7] ss:$0 sm:$0xff] }
 0x11d   :  { %v224_v30 = vpop.f32.mrf.mxu0 }
 0x11e   :  { %v272_v31 = vpack.c.bf16 %v268_v28, %v268_v28 }
 0x11f   :  { %v260_v34 = vpop.f32.mrf.mxu0 }
 0x120   :  { %v261_v35 = vadd.f32 %v260_v34, %v132_v29  ;;  %703 = vmatprep.mubr.bf16.mxu0 %v272_v31 }
 0x121   :  { %v262_v36 = vpop.f32.mrf.mxu0  ;;  %704 = vmatmul.mubr.bf16.vlgmr.msra.gmra.mxu0 %v271_v33 }
 0x122   :  { %v263_v37 = vadd.f32 %v262_v36, %v136_v32  ;;  %v269_v38 = vmax.f32 %v261_v35, 0.0  ;;  %1133 = vmatpush3.bf16.msra.mxu0 %v1276_v55  ;;  %1136 = vmatprep.mubr.msk.bf16.mxu0 %vm1450_vm1, %v1449_v56 }
 0x123   :  { %v264_v39 = vpop.f32.mrf.mxu0  ;;  %1134 = vmatprep.subr.bf16.mxu0 %v1449_v56 }
 0x124   :  { %v270_v40 = vmax.f32 %v263_v37, 0.0  ;;  %v273_v44 = vpack.c.bf16 %v269_v38, %v269_v38 }
 0x125   :  { %v265_v41 = vpop.f32.mrf.mxu0 }
 0x126   :  { %v274_v42 = vpack.c.bf16 %v270_v40, %v270_v40  ;;  %1135 = vmatpush3.bf16.msra.mxu0 %v1279_v59 }
 0x128   :  { %744 = vmatprep.mubr.bf16.mxu1 %v274_v42 }
 0x129   :  { %745 = vmatmul.mubr.bf16.vlgmr.msra.gmra.mxu1 %v273_v44  ;;  %1137 = vmatmul.mubr.msk.bf16.vlgmr.msra.gmra.mxu0 %vm181_vm0, %v1515_v7 }
 0x12a   :  { %1111 = vmatpush3.bf16.msra.mxu1 %v1265_v43 }
 0x12b   :  { %1112 = vmatprep.subr.bf16.mxu1 %v1266_v45 }
 0x12e   :  { %1113 = vmatpush3.bf16.msra.mxu1 %v1267_v46 }
 0x12f   :  { %1114 = vmatprep.subr.bf16.mxu1 %v1268_v47 }
 0x132   :  { %1115 = vmatpush3.bf16.msra.mxu1 %v1269_v48 }
 0x133   :  { %1116 = vmatprep.subr.bf16.mxu1 %v1270_v49 }
 0x136   :  { %1117 = vmatpush3.bf16.msra.mxu1 %v1271_v50 }
 0x137   :  { %1118 = vmatprep.subr.bf16.mxu1 %v1272_v51 }
 0x13a   :  { %1119 = vmatpush3.bf16.msra.mxu1 %v1273_v52 }
 0x13b   :  { %1120 = vmatprep.subr.bf16.mxu1 %v1274_v53 }
 0x13e   :  { %1121 = vmatpush3.bf16.msra.mxu1 %v1275_v54 }
 0x13f   :  { %1122 = vmatprep.subr.bf16.mxu1 %v1277_v57 }
 0x142   :  { %1123 = vmatpush3.bf16.msra.mxu1 %v1278_v58 }
 0x143   :  { %1124 = vmatprep.subr.bf16.mxu1 %v1280_v60 }
 0x146   :  { %1125 = vmatpush3.bf16.msra.mxu1 %v1281_v61 }
 0x1e1   :  { %v705_v63 = vpop.f32.mrf.mxu0 }
 0x1e2   :  { %v706_v5 = vadd.f32 %v705_v63, %v344_v1 }
 0x1e3   :  { %v707_v0 = vpop.f32.mrf.mxu0 }
 0x1e4   :  { %v708_v8 = vadd.f32 %v707_v0, %v348_v3 }
 0x1e5   :  { %v709_v2 = vpop.f32.mrf.mxu0 }
 0x1e7   :  { %v710_v4 = vpop.f32.mrf.mxu0 }
 0x1e9   :  { %v746_v6 = vpop.f32.mrf.mxu1  ;;  %v839_v15 = vpop.f32.mrf.mxu0 }
 0x1ea   :  { %v747_v9 = vadd.f32 %v746_v6, %v706_v5 }
 0x1eb   :  { %v748_v10 = vpop.f32.mrf.mxu1  ;;  %v1138_v20 = vpop.f32.mrf.mxu0 }
 0x1ec   :  { %v749_v7 = vadd.f32 %v748_v10, %v708_v8  ;;  %v753_v11 = vmax.f32 %v747_v9, 0.0 }
 0x1ed   :  { %v750_v12 = vpop.f32.mrf.mxu1  ;;  %v842_v21 = vpop.f32.mrf.mxu0 }
 0x1ee   :  { %v754_v13 = vmax.f32 %v749_v7, 0.0  ;;  %v755_v19 = vpack.c.bf16 %v753_v11, %v753_v11 }
 0x1ef   :  { %v751_v16 = vpop.f32.mrf.mxu1  ;;  %v1139_v14 = vpop.f32.mrf.mxu0 }
 0x1f0   :  { %v756_v18 = vpack.c.bf16 %v754_v13, %v754_v13 }
 0x1f2   :  { %973 = vmatprep.mubr.bf16.mxu1 %v756_v18 }
 0x1f3   :  { %974 = vmatmul.mubr.bf16.vlgmr.msra.gmra.mxu1 %v755_v19 }
 0x2b3   :  { %v1126_v17 = vpop.f32.mrf.mxu1 }
 0x2b5   :  { %v1127_v22 = vpop.f32.mrf.mxu1 }
 0x2b6   :  { %v1128_v23 = vadd.f32 %v1127_v22, %v1126_v17 }
 0x2b7   :  { %v1129_v25 = vpop.f32.mrf.mxu1 }
 0x2b8   :  { %v976_v26 = vadd.f32 %v1128_v23, %v839_v15 }
 0x2b9   :  { %v1130_v27 = vpop.f32.mrf.mxu1 }
 0x2ba   :  { %v988_v28 = vadd.f32 %v1106_v24, %v976_v26 }
 0x2bc   :  { %v989_v29 = vsub.f32 0.0, %v988_v28 }
 0x2be   :  { %v990_v30 = vmul.f32 1.442695, %v989_v29 }
 0x2c0   :  { %1282 = vpow2.f32 %v990_v30 }
 0x2cd   :  { %v1283_v31 = vpop.eup %1282 }
 0x2ce   :  { %v992_v32 = vadd.f32 1.0, %v1283_v31 }
 0x2d0   :  { %1284 = vrcp.f32 %v992_v32 }
 0x2dd   :  { %v1285_v33 = vpop.eup %1284 }
 0x2de   :  { %994 = vst [vmem:[#allocation13] sm:$0xff] %v1285_v33 }
 0x2df   :  { %1417 = shalt.err (!%p1414_p6)
}
 0x2e0   :  { %1004 = dma.vmem_to_hbm [thread:$0]  %s1002_s17, 128, %s1554_s8, [#allocation4]  }
 0x2e1   :  { %1434 = dma.done.wait [#allocation4], 128  }
 0x2e2   :  { %1435 = vsyncadd [#allocation4], 4294967168 }
 0x2e3   :  { %1008 = vsyncpa [#allocation3], 1 }
 0x2e4   :  { %1009 = vsyncpa [#allocation6], 1 }
 0x2e5   :  { %1010 = vsyncpa [#allocation9], 1 }
 0x2e6   :  { %1011 = vsyncpa [#allocation12], 1 }
 0x2e7   :  { %1012 = vsyncpa [#allocation4], 1 }

</bundles_post_ra>
